<compile_context>
chip_gen: v5e
topology: v5e:2x2
jax: 0.10.0
libtpu: 0.0.40
codegen_flags: <defaults>
</compile_context>

<pallas_src>
import jax
import jax.numpy as jnp
from jax.experimental import pallas as pl
from jax.experimental.pallas import tpu as pltpu


# ---------------------------------------------------------------------------
# Pallas kernel: backbone projections + fused-concat classifier MLP + sigmoid.
# ---------------------------------------------------------------------------
def _midfuse_kernel(tp_ref, sp_ref,            # pooled backbone activations (f32)
                    tproj_ref, sproj_ref,      # backbone projection weights (f32)
                    w1t_ref, w1s_ref, b1_ref,  # Linear(F, 512), w1 pre-split (bf16/f32)
                    w2_ref, b2_ref,            # Linear(512, 256)
                    w3_ref, b3_ref,            # Linear(256, 1), w3 as a [1, 256] row
                    o_ref):
    # Fused backbone projections: text_feat = pooled_text @ text_proj, etc.
    text_feat = jnp.dot(tp_ref[...], tproj_ref[...],
                        preferred_element_type=jnp.float32)           # [TB, TF]
    speech_feat = jnp.dot(sp_ref[...], sproj_ref[...],
                          preferred_element_type=jnp.float32)         # [TB, SF]

    # Fused concat + Linear(F, 512): cat([t, s]) @ w1 == t @ w1_t + s @ w1_s.
    h = jnp.dot(text_feat.astype(jnp.bfloat16), w1t_ref[...],
                preferred_element_type=jnp.float32)
    h = h + jnp.dot(speech_feat.astype(jnp.bfloat16), w1s_ref[...],
                    preferred_element_type=jnp.float32)
    h = h + b1_ref[...]                                               # [TB, 512]

    # Linear(512, 256)
    h = jnp.dot(h.astype(jnp.bfloat16), w2_ref[...],
                preferred_element_type=jnp.float32) + b2_ref[...]     # [TB, 256]

    # Linear(256, 1): N=1 output -> VPU multiply + lane reduction (skip MXU).
    h = jnp.sum(h * w3_ref[...].astype(jnp.float32),
                axis=-1, keepdims=True) + b3_ref[...]                 # [TB, 1]

    o_ref[...] = jax.nn.sigmoid(h)


def _nbytes(a):
    return int(a.size) * int(a.dtype.itemsize)


def midfuse_fused(text_pooled, speech_pooled, backbone_params, clf_params,
                  *, tb=256):
    """Single fused pallas_call: projections + concat + classifier + sigmoid."""
    B, E = text_pooled.shape
    _, M = speech_pooled.shape
    tproj = backbone_params["text_proj"]
    sproj = backbone_params["speech_proj"]
    w1t, w1s = clf_params["w1_text"], clf_params["w1_speech"]
    b1, w2, b2 = clf_params["b1"], clf_params["w2"], clf_params["b2"]
    w3_row, b3 = clf_params["w3_row"], clf_params["b3"]

    TF, SF = tproj.shape[1], sproj.shape[1]
    H1, H2 = w1t.shape[1], w2.shape[1]

    # Batch-row grid; weights get constant index maps so they stay VMEM-resident.
    TB = B if B <= tb else tb
    grid = (pl.cdiv(B, TB),)

    def row_spec(d):
        return pl.BlockSpec((TB, d), lambda i: (i, 0))

    def resident(arr):
        return pl.BlockSpec(arr.shape, lambda i: (0, 0))

    flops = 2 * B * (E * TF + M * SF + TF * H1 + SF * H1 + H1 * H2 + H2)
    bytes_accessed = (_nbytes(text_pooled) + _nbytes(speech_pooled) + B * 4
                      + _nbytes(tproj) + _nbytes(sproj)
                      + _nbytes(w1t) + _nbytes(w1s) + _nbytes(b1)
                      + _nbytes(w2) + _nbytes(b2)
                      + _nbytes(w3_row) + _nbytes(b3))

    return pl.pallas_call(
        _midfuse_kernel,
        out_shape=jax.ShapeDtypeStruct((B, 1), jnp.float32),
        grid=grid,
        in_specs=[
            row_spec(E), row_spec(M),
            resident(tproj), resident(sproj),
            resident(w1t), resident(w1s), resident(b1),
            resident(w2), resident(b2),
            resident(w3_row), resident(b3),
        ],
        out_specs=pl.BlockSpec((TB, 1), lambda i: (i, 0)),
        compiler_params=pltpu.CompilerParams(
            dimension_semantics=("parallel",)),
        cost_estimate=pl.CostEstimate(flops=flops, transcendentals=B,
                                      bytes_accessed=bytes_accessed),
    )(text_pooled, speech_pooled, tproj, sproj,
      w1t, w1s, b1, w2, b2, w3_row, b3)


# ---------------------------------------------------------------------------
# Deterministic parameter init (mimics PyTorch nn.Linear U(-1/sqrt(fan_in), .)).
# ---------------------------------------------------------------------------
def _linear_init(key, fan_in, fan_out):
    kw, kb = jax.random.split(key)
    bound = 1.0 / jnp.sqrt(jnp.float32(fan_in))
    w = jax.random.uniform(kw, (fan_in, fan_out), jnp.float32, -bound, bound)
    b = jax.random.uniform(kb, (1, fan_out), jnp.float32, -bound, bound)
    return w, b


def init_classifier_params(key, text_features, speech_features,
                           wdtype=jnp.bfloat16):
    f = text_features + speech_features
    k1, k2, k3 = jax.random.split(key, 3)
    w1, b1 = _linear_init(k1, f, 512)
    w2, b2 = _linear_init(k2, 512, 256)
    w3, b3 = _linear_init(k3, 256, 1)
    kernel_params = {
        # w1 pre-split so the feature concat fuses into the first matmul.
        "w1_text": w1[:text_features].astype(wdtype),
        "w1_speech": w1[text_features:].astype(wdtype),
        "b1": b1,
        "w2": w2.astype(wdtype), "b2": b2,
        # w3 stored as a [1, 256] row: layer 3 is a VPU mul + lane reduction.
        "w3_row": w3.T.astype(wdtype), "b3": b3,
    }
    f32_params = {"w1": w1, "b1": b1, "w2": w2, "b2": b2, "w3": w3, "b3": b3}
    return kernel_params, f32_params


# ---------------------------------------------------------------------------
# Stub backbones (plain-JAX glue).
# TODO(synk): the real text_model / speech_model are external pretrained
# networks (frozen in MidFuse.train/eval); their bodies have no in-script
# Pallas equivalent, so tiny deterministic pool+project stubs stand in. The
# pooling (embedding gather + masked mean) stays in plain JAX; the projection
# matmuls are fused into the Pallas kernel above.
# ---------------------------------------------------------------------------
def text_pool(input_ids, attention_mask, params):
    emb = params["text_emb"][input_ids]                       # [B, S, E]
    mask = attention_mask[..., None].astype(jnp.float32)      # [B, S, 1]
    return (emb * mask).sum(1) / jnp.maximum(mask.sum(1), 1.0)  # [B, E]


def speech_pool(speech_input):
    return speech_input.mean(axis=1)                          # [B, n_mels]


def init_backbone_params(key, vocab, emb_dim, n_mels,
                         text_features, speech_features):
    k1, k2, k3 = jax.random.split(key, 3)
    return {
        "text_emb": jax.random.normal(k1, (vocab, emb_dim), jnp.float32) * 0.02,
        "text_proj": jax.random.normal(k2, (emb_dim, text_features),
                                       jnp.float32) * 0.1,
        "speech_proj": jax.random.normal(k3, (n_mels, speech_features),
                                         jnp.float32) * 0.1,
    }


# ---------------------------------------------------------------------------
# Full MidFuse.forward equivalent.
# ---------------------------------------------------------------------------
def midfuse_forward(text_input, speech_input, backbone_params, clf_params):
    text_pooled = text_pool(text_input["input_ids"],
                            text_input["attention_mask"], backbone_params)
    speech_pooled = speech_pool(speech_input)
    # projections + concat + classifier + sigmoid: one fused Pallas kernel.
    return midfuse_fused(text_pooled, speech_pooled, backbone_params, clf_params)


if __name__ == "__main__":
    key = jax.random.PRNGKey(0)
    k_bb, k_clf, k_ids, k_speech = jax.random.split(key, 4)

    B, S, VOCAB, EMB = 2, 8, 100, 32
    N_FRAMES, N_MELS = 16, 40
    TEXT_FEATURES, SPEECH_FEATURES = 32, 32

    backbone_params = init_backbone_params(
        k_bb, VOCAB, EMB, N_MELS, TEXT_FEATURES, SPEECH_FEATURES)
    clf_params, clf_f32 = init_classifier_params(
        k_clf, TEXT_FEATURES, SPEECH_FEATURES)

    text_input = {
        "input_ids": jax.random.randint(k_ids, (B, S), 0, VOCAB),
        "attention_mask": jnp.ones((B, S), jnp.int32),
    }
    speech_input = jax.random.normal(k_speech, (B, N_FRAMES, N_MELS), jnp.float32)

    out = midfuse_forward(text_input, speech_input, backbone_params, clf_params)
    out = jax.block_until_ready(out)

    assert out.shape == (B, 1)
    assert bool(jnp.all((out >= 0.0) & (out <= 1.0)))

    # Reference check in plain JAX against the original (full-f32, explicit
    # concat) math; tolerance covers the kernel's bf16 weight/activation path.
    tp = text_pool(text_input["input_ids"], text_input["attention_mask"],
                   backbone_params)
    sp = speech_pool(speech_input)
    tf = tp @ backbone_params["text_proj"]
    sf = sp @ backbone_params["speech_proj"]
    feats = jnp.concatenate([tf, sf], axis=1)
    h = feats @ clf_f32["w1"] + clf_f32["b1"]
    h = h @ clf_f32["w2"] + clf_f32["b2"]
    h = h @ clf_f32["w3"] + clf_f32["b3"]
    ref = jax.nn.sigmoid(h)
    assert jnp.allclose(out, ref, atol=2e-2), (out, ref)

    print("KERNEL_OK")
</pallas_src>

<mosaic_0001>
module attributes {stable_mosaic.version = 11 : i64} {
  func.func @_midfuse_kernel(%arg0: i32, %arg1: memref<2x32xf32, #tpu.memory_space<vmem>>, %arg2: memref<2x40xf32, #tpu.memory_space<vmem>>, %arg3: memref<32x32xf32, #tpu.memory_space<vmem>>, %arg4: memref<40x32xf32, #tpu.memory_space<vmem>>, %arg5: memref<32x512xbf16, #tpu.memory_space<vmem>>, %arg6: memref<32x512xbf16, #tpu.memory_space<vmem>>, %arg7: memref<1x512xf32, #tpu.memory_space<vmem>>, %arg8: memref<512x256xbf16, #tpu.memory_space<vmem>>, %arg9: memref<1x256xf32, #tpu.memory_space<vmem>>, %arg10: memref<1x256xbf16, #tpu.memory_space<vmem>>, %arg11: memref<1x1xf32, #tpu.memory_space<vmem>>, %arg12: memref<2x1xf32, #tpu.memory_space<vmem>>) attributes {dimension_semantics = [#tpu.dimension_semantics<parallel>], iteration_bounds = array<i64: 1>, scalar_prefetch = 0 : i64, scratch_operands = 0 : i64, tpu.core_type = #tpu.core_type<tc>, window_params = [{transform_indices = @transform_0, window_bounds = array<i64: 2, 32>}, {transform_indices = @transform_1, window_bounds = array<i64: 2, 40>}, {pipeline_mode = #tpu.pipeline_mode<synchronous>, transform_indices = @transform_2, window_bounds = array<i64: 32, 32>}, {pipeline_mode = #tpu.pipeline_mode<synchronous>, transform_indices = @transform_3, window_bounds = array<i64: 40, 32>}, {pipeline_mode = #tpu.pipeline_mode<synchronous>, transform_indices = @transform_4, window_bounds = array<i64: 32, 512>}, {pipeline_mode = #tpu.pipeline_mode<synchronous>, transform_indices = @transform_5, window_bounds = array<i64: 32, 512>}, {pipeline_mode = #tpu.pipeline_mode<synchronous>, transform_indices = @transform_6, window_bounds = array<i64: 1, 512>}, {pipeline_mode = #tpu.pipeline_mode<synchronous>, transform_indices = @transform_7, window_bounds = array<i64: 512, 256>}, {pipeline_mode = #tpu.pipeline_mode<synchronous>, transform_indices = @transform_8, window_bounds = array<i64: 1, 256>}, {pipeline_mode = #tpu.pipeline_mode<synchronous>, transform_indices = @transform_9, window_bounds = array<i64: 1, 256>}, {pipeline_mode = #tpu.pipeline_mode<synchronous>, transform_indices = @transform_10, window_bounds = array<i64: 1, 1>}, {transform_indices = @transform_11, window_bounds = array<i64: 2, 1>}]} {
    %c0 = arith.constant 0 : index
    %c0_0 = arith.constant 0 : index
    %0 = vector.load %arg1[%c0, %c0_0] : memref<2x32xf32, #tpu.memory_space<vmem>>, vector<2x32xf32>
    %c0_1 = arith.constant 0 : index
    %c0_2 = arith.constant 0 : index
    %1 = vector.load %arg3[%c0_1, %c0_2] : memref<32x32xf32, #tpu.memory_space<vmem>>, vector<32x32xf32>
    %cst = arith.constant dense<0.000000e+00> : vector<2x32xf32>
    %2 = tpu.matmul %0, %1, %cst {dimension_numbers = #tpu.dot_dimension_numbers<[1], [0], [0], [1], [0, 0, 1, 1], [], []>} : vector<2x32xf32>, vector<32x32xf32>, vector<2x32xf32> -> vector<2x32xf32>
    %c0_3 = arith.constant 0 : index
    %c0_4 = arith.constant 0 : index
    %3 = vector.load %arg2[%c0_3, %c0_4] : memref<2x40xf32, #tpu.memory_space<vmem>>, vector<2x40xf32>
    %c0_5 = arith.constant 0 : index
    %c0_6 = arith.constant 0 : index
    %4 = vector.load %arg4[%c0_5, %c0_6] : memref<40x32xf32, #tpu.memory_space<vmem>>, vector<40x32xf32>
    %cst_7 = arith.constant dense<0.000000e+00> : vector<2x32xf32>
    %5 = tpu.matmul %3, %4, %cst_7 {dimension_numbers = #tpu.dot_dimension_numbers<[1], [0], [0], [1], [0, 0, 1, 1], [], []>} : vector<2x40xf32>, vector<40x32xf32>, vector<2x32xf32> -> vector<2x32xf32>
    %6 = arith.truncf %2 : vector<2x32xf32> to vector<2x32xbf16>
    %c0_8 = arith.constant 0 : index
    %c0_9 = arith.constant 0 : index
    %7 = vector.load %arg5[%c0_8, %c0_9] : memref<32x512xbf16, #tpu.memory_space<vmem>>, vector<32x512xbf16>
    %cst_10 = arith.constant dense<0.000000e+00> : vector<2x512xf32>
    %8 = tpu.matmul %6, %7, %cst_10 {dimension_numbers = #tpu.dot_dimension_numbers<[1], [0], [0], [1], [0, 0, 1, 1], [], []>} : vector<2x32xbf16>, vector<32x512xbf16>, vector<2x512xf32> -> vector<2x512xf32>
    %9 = arith.truncf %5 : vector<2x32xf32> to vector<2x32xbf16>
    %c0_11 = arith.constant 0 : index
    %c0_12 = arith.constant 0 : index
    %10 = vector.load %arg6[%c0_11, %c0_12] : memref<32x512xbf16, #tpu.memory_space<vmem>>, vector<32x512xbf16>
    %cst_13 = arith.constant dense<0.000000e+00> : vector<2x512xf32>
    %11 = tpu.matmul %9, %10, %cst_13 {dimension_numbers = #tpu.dot_dimension_numbers<[1], [0], [0], [1], [0, 0, 1, 1], [], []>} : vector<2x32xbf16>, vector<32x512xbf16>, vector<2x512xf32> -> vector<2x512xf32>
    %12 = arith.addf %8, %11 : vector<2x512xf32>
    %c0_14 = arith.constant 0 : index
    %c0_15 = arith.constant 0 : index
    %13 = vector.load %arg7[%c0_14, %c0_15] : memref<1x512xf32, #tpu.memory_space<vmem>>, vector<1x512xf32>
    %14 = vector.broadcast %13 : vector<1x512xf32> to vector<2x512xf32>
    %15 = arith.addf %12, %14 : vector<2x512xf32>
    %16 = arith.truncf %15 : vector<2x512xf32> to vector<2x512xbf16>
    %c0_16 = arith.constant 0 : index
    %c0_17 = arith.constant 0 : index
    %17 = vector.load %arg8[%c0_16, %c0_17] : memref<512x256xbf16, #tpu.memory_space<vmem>>, vector<512x256xbf16>
    %cst_18 = arith.constant dense<0.000000e+00> : vector<2x256xf32>
    %18 = tpu.matmul %16, %17, %cst_18 {dimension_numbers = #tpu.dot_dimension_numbers<[1], [0], [0], [1], [0, 0, 1, 1], [], []>} : vector<2x512xbf16>, vector<512x256xbf16>, vector<2x256xf32> -> vector<2x256xf32>
    %c0_19 = arith.constant 0 : index
    %c0_20 = arith.constant 0 : index
    %19 = vector.load %arg9[%c0_19, %c0_20] : memref<1x256xf32, #tpu.memory_space<vmem>>, vector<1x256xf32>
    %20 = vector.broadcast %19 : vector<1x256xf32> to vector<2x256xf32>
    %21 = arith.addf %18, %20 : vector<2x256xf32>
    %c0_21 = arith.constant 0 : index
    %c0_22 = arith.constant 0 : index
    %22 = vector.load %arg10[%c0_21, %c0_22] : memref<1x256xbf16, #tpu.memory_space<vmem>>, vector<1x256xbf16>
    %23 = arith.extf %22 : vector<1x256xbf16> to vector<1x256xf32>
    %24 = vector.broadcast %23 : vector<1x256xf32> to vector<2x256xf32>
    %25 = arith.mulf %21, %24 : vector<2x256xf32>
    %cst_23 = arith.constant dense<0.000000e+00> : vector<2xf32>
    %26 = vector.multi_reduction <add>, %25, %cst_23 [1] : vector<2x256xf32> to vector<2xf32>
    %27 = vector.shape_cast %26 : vector<2xf32> to vector<2x1xf32>
    %c0_24 = arith.constant 0 : index
    %c0_25 = arith.constant 0 : index
    %28 = vector.load %arg11[%c0_24, %c0_25] : memref<1x1xf32, #tpu.memory_space<vmem>>, vector<1x1xf32>
    %29 = vector.broadcast %28 : vector<1x1xf32> to vector<2x1xf32>
    %30 = arith.addf %27, %29 : vector<2x1xf32>
    %31 = arith.negf %30 : vector<2x1xf32>
    %32 = math.exp %31 : vector<2x1xf32>
    %cst_26 = arith.constant 1.000000e+00 : f32
    %33 = vector.broadcast %cst_26 : f32 to vector<2x1xf32>
    %34 = arith.addf %33, %32 : vector<2x1xf32>
    %35 = arith.divf %33, %34 : vector<2x1xf32>
    %c0_27 = arith.constant 0 : index
    %c0_28 = arith.constant 0 : index
    %36 = vector.load %arg12[%c0_27, %c0_28] : memref<2x1xf32, #tpu.memory_space<vmem>>, vector<2x1xf32>
    tpu.vector_store %arg12[%c0_27, %c0_28], %35 {strides = array<i32>} : memref<2x1xf32, #tpu.memory_space<vmem>>, vector<2x1xf32>,
    return
  }
  func.func @transform_0(%arg0: i32) -> (i32, i32) {
    %c0_i32 = arith.constant 0 : i32
    %c0_i32_0 = arith.constant 0 : i32
    return %arg0, %c0_i32 : i32, i32
  }
  func.func @transform_1(%arg0: i32) -> (i32, i32) {
    %c0_i32 = arith.constant 0 : i32
    %c0_i32_0 = arith.constant 0 : i32
    return %arg0, %c0_i32 : i32, i32
  }
  func.func @transform_2(%arg0: i32) -> (i32, i32) {
    %c0_i32 = arith.constant 0 : i32
    %c0_i32_0 = arith.constant 0 : i32
    %c0_i32_1 = arith.constant 0 : i32
    return %c0_i32, %c0_i32_0 : i32, i32
  }
  func.func @transform_3(%arg0: i32) -> (i32, i32) {
    %c0_i32 = arith.constant 0 : i32
    %c0_i32_0 = arith.constant 0 : i32
    %c0_i32_1 = arith.constant 0 : i32
    return %c0_i32, %c0_i32_0 : i32, i32
  }
  func.func @transform_4(%arg0: i32) -> (i32, i32) {
    %c0_i32 = arith.constant 0 : i32
    %c0_i32_0 = arith.constant 0 : i32
    %c0_i32_1 = arith.constant 0 : i32
    return %c0_i32, %c0_i32_0 : i32, i32
  }
  func.func @transform_5(%arg0: i32) -> (i32, i32) {
    %c0_i32 = arith.constant 0 : i32
    %c0_i32_0 = arith.constant 0 : i32
    %c0_i32_1 = arith.constant 0 : i32
    return %c0_i32, %c0_i32_0 : i32, i32
  }
  func.func @transform_6(%arg0: i32) -> (i32, i32) {
    %c0_i32 = arith.constant 0 : i32
    %c0_i32_0 = arith.constant 0 : i32
    %c0_i32_1 = arith.constant 0 : i32
    return %c0_i32, %c0_i32_0 : i32, i32
  }
  func.func @transform_7(%arg0: i32) -> (i32, i32) {
    %c0_i32 = arith.constant 0 : i32
    %c0_i32_0 = arith.constant 0 : i32
    %c0_i32_1 = arith.constant 0 : i32
    return %c0_i32, %c0_i32_0 : i32, i32
  }
  func.func @transform_8(%arg0: i32) -> (i32, i32) {
    %c0_i32 = arith.constant 0 : i32
    %c0_i32_0 = arith.constant 0 : i32
    %c0_i32_1 = arith.constant 0 : i32
    return %c0_i32, %c0_i32_0 : i32, i32
  }
  func.func @transform_9(%arg0: i32) -> (i32, i32) {
    %c0_i32 = arith.constant 0 : i32
    %c0_i32_0 = arith.constant 0 : i32
    %c0_i32_1 = arith.constant 0 : i32
    return %c0_i32, %c0_i32_0 : i32, i32
  }
  func.func @transform_10(%arg0: i32) -> (i32, i32) {
    %c0_i32 = arith.constant 0 : i32
    %c0_i32_0 = arith.constant 0 : i32
    %c0_i32_1 = arith.constant 0 : i32
    return %c0_i32, %c0_i32_0 : i32, i32
  }
  func.func @transform_11(%arg0: i32) -> (i32, i32) {
    %c0_i32 = arith.constant 0 : i32
    %c0_i32_0 = arith.constant 0 : i32
    return %arg0, %c0_i32 : i32, i32
  }
}

</mosaic_0001>

<bundles_post_ra>
// kernel: tpu_custom_call.1
= control target key start
LH: loop header
LB: loop body
LE: loop exit
PB: predicated region body
PF: predicated region fallthrough
CT: control target
= control target key end

     0   :  { %s1584_s0 = inlined_call_operand.vmem [shape: f32[2,32], index: 0, kind: input, shape index: {}]   ;;  %s1585_s1 = inlined_call_operand.vmem [shape: f32[2,40], index: 1, kind: input, shape index: {}]   ;;  %s1586_s2 = inlined_call_operand.hbm [shape: f32[32,32], index: 2, kind: input, shape index: {}]   ;;  %s1587_s3 = inlined_call_operand.vmem [shape: f32[40,32], index: 3, kind: input, shape index: {}]   ;;  %s1588_s4 = inlined_call_operand.vmem [shape: bf16[32,512], index: 4, kind: input, shape index: {}]   ;;  %s1589_s5 = inlined_call_operand.hbm [shape: bf16[32,512], index: 5, kind: input, shape index: {}]   ;;  %s1590_s6 = inlined_call_operand.vmem [shape: f32[1,512], index: 6, kind: input, shape index: {}]   ;;  %s1591_s7 = inlined_call_operand.hbm [shape: bf16[512,256], index: 7, kind: input, shape index: {}]   ;;  %s1592_s8 = inlined_call_operand.vmem [shape: f32[1,256], index: 8, kind: input, shape index: {}]   ;;  %s1593_s9 = inlined_call_operand.vmem [shape: bf16[1,256], index: 9, kind: input, shape index: {}]   ;;  %s1594_s10 = inlined_call_operand.<no memory space> [shape: f32[1,1], index: 10, kind: input, shape index: {}]   ;;  %s1595_s11 = inlined_call_operand.vmem [shape: f32[2,1], index: 11, kind: output, shape index: {}]  }
   0x1   :  { %v16_v0 = vstv %s1594_s10 }
   0x2   :  { %17 = vst [vmem:[#allocation2] sm:$0x1] %v16_v0 }
   0x3   :  { %18 = vsyncpa [#allocation4], 0 }
   0x4   :  { %19 = vsyncpa [#allocation6], 0  ;;  %s45_s21 = sshll.u32 %s1589_s5, 4  ;;  %s1415_s22 = smov [#allocation5]   ;;  %s46_s21 = int_to_ptr.hbm [resolvable:$true] %s45_s21 }
   0x5   :  { %s47_s23 = sshll.u32 %s1415_s22, 4  ;;  %s28_s26 = sshll.u32 %s1586_s2, 4  ;;  %s48_s23 = int_to_ptr.vmem [resolvable:$true] %s47_s23  ;;  %s29_s26 = int_to_ptr.hbm [resolvable:$true] %s28_s26 }
   0x6   :  { %s1416_s27 = smov 256   ;;  %s1417_s28 = smov 16  }
   0x7   :  { %53 = dma.hbm_to_vmem [thread:$0]  %s46_s21, 1024, %s48_s23, [#allocation6], %s1416_s27, %s1416_s27, %s1417_s28  }
   0x8   :  { %s1418_s10 = smov [#allocation3]   ;;  %s1419_s30 = smov 128  }
   0x9   :  { %s30_s29 = sshll.u32 %s1418_s10, 4  ;;  %s1420_s12 = smov 8   ;;  %s31_s29 = int_to_ptr.vmem [resolvable:$true] %s30_s29 }
   0xa   :  { %36 = dma.hbm_to_vmem [thread:$0]  %s29_s26, 512, %s31_s29, [#allocation4], %s1419_s30, %s1419_s30, %s1420_s12  }
   0xb   :  { %s60_s14 = sshll.u32 %s1591_s7, 4  ;;  %s1421_s15 = smov [#allocation7]   ;;  %s61_s14 = int_to_ptr.hbm [resolvable:$true] %s60_s14 }
   0xc   :  { %s62_s16 = sshll.u32 %s1421_s15, 4  ;;  %s63_s16 = int_to_ptr.vmem [resolvable:$true] %s62_s16 }
   0xd   :  { %68 = dma.hbm_to_vmem [thread:$0]  %s61_s14, 8192, %s63_s16, [#allocation6], %s1419_s30, %s1419_s30, %s1420_s12  }
   0xe   :  { %1411 = dma.done.wait [#allocation4], 512  }
   0xf   :  { %1412 = vsyncadd [#allocation4], 4294966784 }
  0x10   :  { %1413 = dma.done.wait [#allocation6], 9216  }
  0x11   :  { %1414 = vsyncadd [#allocation6], 4294958080  ;;  %v122_v1 = vld [vmem:[%s1587_s3 + $0x20] sm:$0xff]  ;;  %v121_v2 = vld [vmem:[%s1587_s3 + $0x18] sm:$0xff]  ;;  %vm123_vm0 = vcmask 326656   ;;  %vm93_vm1 = vcmask 261120  }
  0x12   :  { %138 = vmatpush.msra.mxu1 %v122_v1  ;;  %v120_v3 = vld [vmem:[%s1587_s3 + $0x10] sm:$0xff]  ;;  %v92_v4 = vld [vmem:[#allocation3 + $0x18] sm:$0xff]  ;;  %v119_v6 = vld [vmem:[%s1587_s3 + $0x8] sm:$0xff]  ;;  %vm878_vm2 = vcmask 1041408   ;;  %vm908_vm6 = vcmask 1024  }
  0x13   :  { %v91_v5 = vld [vmem:[#allocation3 + $0x10] sm:$0xff]  ;;  %109 = vmatpush.msra.mxu0 %v92_v4  ;;  %v90_v7 = vld [vmem:[#allocation3 + $0x8] sm:$0xff]  ;;  %v936_v8 = vld [vmem:[#allocation5 + $0x20] sm:$0xf] }
  0x14   :  { %139 = vmatpush.msra.mxu1 %v121_v2  ;;  %v118_v9 = vld [vmem:[%s1587_s3] sm:$0xff]  ;;  %v1261_v10 = vld [vmem:[#allocation5 + $0x2c] sm:$0xf0]  ;;  %v938_v12 = vld [vmem:[#allocation5 + $0x30] sm:$0xf0] }
  0x15   :  { %v1259_v11 = vld [vmem:[#allocation5 + $0x24] sm:$0xf]  ;;  %110 = vmatpush.msra.mxu0 %v91_v5  ;;  %v937_v13 = vor.u32 %v1261_v10, %v936_v8  ;;  %v944_v15 = vld [vmem:[#allocation5 + $0x28] sm:$0xf]  ;;  %v1262_v16 = vld [vmem:[#allocation5 + $0x34] sm:$0xf0] }
  0x16   :  { %140 = vmatpush.msra.mxu1 %v120_v3  ;;  %v941_v14 = vor.u32 %v1259_v11, %v938_v12  ;;  %v1260_v17 = vld [vmem:[#allocation5 + $0x2c] sm:$0xf]  ;;  %v89_v18 = vld [vmem:[#allocation3] sm:$0xff]  ;;  %v946_v19 = vld [vmem:[#allocation5 + $0x38] sm:$0xf0]  ;;  %v945_v22 = vor.u32 %v1262_v16, %v944_v15 }
  0x17   :  { %v117_v20 = vld [vmem:[%s1585_s1] sm:$0x3]  ;;  %111 = vmatpush.msra.mxu0 %v90_v7  ;;  %v949_v23 = vor.u32 %v1260_v17, %v946_v19  ;;  %214 = vmatpush.bf16.msra.mxu2 %v937_v13  ;;  %v1257_v25 = vld [vmem:[#allocation5 + $0xc] sm:$0xf0]  ;;  %v1255_v26 = vld [vmem:[#allocation5 + $0x4] sm:$0xf] }
  0x18   :  { %141 = vmatpush.msra.mxu1 %v119_v6  ;;  %v88_v21 = vld [vmem:[%s1584_s0] sm:$0x3]  ;;  %227 = vmatpush.bf16.msra.mxu3 %v941_v14  ;;  %v922_v28 = vld [vmem:[#allocation5 + $0x10] sm:$0xf0]  ;;  %v928_v29 = vld [vmem:[#allocation5 + $0x8] sm:$0xf] }
  0x19   :  { %112 = vmatpush.msra.mxu0 %v89_v18  ;;  %v920_v24 = vld [vmem:[#allocation5] sm:$0xf]  ;;  %v1258_v30 = vld [vmem:[#allocation5 + $0x14] sm:$0xf0]  ;;  %v925_v31 = vor.u32 %v1255_v26, %v922_v28  ;;  %v1256_v33 = vld [vmem:[#allocation5 + $0xc] sm:$0xf] }
  0x1a   :  { %142 = vmatpush.msra.mxu1 %v118_v9  ;;  %916 = vmatmul.msk.f32.vlgmr.msra.gmra.mxu0 %vm93_vm1, %v88_v21  ;;  %v921_v27 = vor.u32 %v1257_v25, %v920_v24  ;;  %v929_v32 = vor.u32 %v1258_v30, %v928_v29  ;;  %v930_v34 = vld [vmem:[#allocation5 + $0x18] sm:$0xf0]  ;;  %v1253_v37 = vld [vmem:[%s1588_s4 + $0x2c] sm:$0xf0]  ;;  %v1251_v38 = vld [vmem:[%s1588_s4 + $0x24] sm:$0xf] }
  0x1b   :  { %917 = vmatmul.msk.f32.vlgmr.msra.gmra.mxu1 %vm123_vm0, %v117_v20  ;;  %240 = vmatpush.bf16.msrb.mxu0 %v945_v22  ;;  %v933_v35 = vor.u32 %v1256_v33, %v930_v34  ;;  %v972_v36 = vld [vmem:[%s1588_s4 + $0x20] sm:$0xf]  ;;  %v974_v40 = vld [vmem:[%s1588_s4 + $0x30] sm:$0xf0]  ;;  %v1249_v42 = vld [vmem:[%s1588_s4 + $0xc] sm:$0xf0] }
  0x1c   :  { %253 = vmatpush.bf16.msrb.mxu1 %v949_v23  ;;  %215 = vmatpush.bf16.msra.mxu2 %v921_v27  ;;  %v973_v39 = vor.u32 %v1253_v37, %v972_v36  ;;  %v956_v41 = vld [vmem:[%s1588_s4] sm:$0xf]  ;;  %v977_v43 = vor.u32 %v1251_v38, %v974_v40  ;;  %v980_v44 = vld [vmem:[%s1588_s4 + $0x28] sm:$0xf]  ;;  %v1254_v45 = vld [vmem:[%s1588_s4 + $0x34] sm:$0xf0] }
  0x1d   :  { %228 = vmatpush.bf16.msra.mxu3 %v925_v31  ;;  %v1252_v46 = vld [vmem:[%s1588_s4 + $0x2c] sm:$0xf]  ;;  %v957_v47 = vor.u32 %v1249_v42, %v956_v41  ;;  %v981_v48 = vor.u32 %v1254_v45, %v980_v44  ;;  %v982_v49 = vld [vmem:[%s1588_s4 + $0x38] sm:$0xf0]  ;;  %v1247_v50 = vld [vmem:[%s1588_s4 + $0x4] sm:$0xf] }
  0x1e   :  { %v958_v51 = vld [vmem:[%s1588_s4 + $0x10] sm:$0xf0]  ;;  %v985_v52 = vor.u32 %v1252_v46, %v982_v49  ;;  %v964_v54 = vld [vmem:[%s1588_s4 + $0x8] sm:$0xf]  ;;  %v1250_v55 = vld [vmem:[%s1588_s4 + $0x14] sm:$0xf0] }
  0x1f   :  { %241 = vmatpush.bf16.msrb.mxu0 %v929_v32  ;;  %v961_v53 = vor.u32 %v1247_v50, %v958_v51  ;;  %v1248_v56 = vld [vmem:[%s1588_s4 + $0xc] sm:$0xf]  ;;  %v965_v57 = vor.u32 %v1250_v55, %v964_v54  ;;  %v966_v58 = vld [vmem:[%s1588_s4 + $0x18] sm:$0xf0]  ;;  %v1176_v60 = vld [vmem:[#allocation7 + $0x170] sm:$0xf] }
  0x20   :  { %254 = vmatpush.bf16.msrb.mxu1 %v933_v35  ;;  %309 = vmatpush.bf16.msrb.mxu2 %v973_v39  ;;  %v969_v59 = vor.u32 %v1248_v56, %v966_v58  ;;  %v1310_v61 = vld [vmem:[#allocation7 + $0x174] sm:$0xf0]  ;;  %v1240_v62 = vld [vmem:[#allocation7 + $0x1f0] sm:$0xf]  ;;  %v1168_v8 = vld [vmem:[#allocation7 + $0x160] sm:$0xf] }
  0x21   :  { %322 = vmatpush.bf16.msrb.mxu3 %v977_v43  ;;  %v1326_v63 = vld [vmem:[#allocation7 + $0x1f4] sm:$0xf0]  ;;  %v1048_v0 = vld [vmem:[#allocation7 + $0x70] sm:$0xf]  ;;  %v1177_v6 = vor.u32 %v1310_v61, %v1176_v60  ;;  %v1308_v9 = vld [vmem:[#allocation7 + $0x164] sm:$0xf0] }
  0x22   :  { %v1278_v1 = vld [vmem:[#allocation7 + $0x74] sm:$0xf0]  ;;  %v1112_v2 = vld [vmem:[#allocation7 + $0xf0] sm:$0xf]  ;;  %v1241_v7 = vor.u32 %v1326_v63, %v1240_v62  ;;  %v1232_v10 = vld [vmem:[#allocation7 + $0x1e0] sm:$0xf]  ;;  %v1169_v18 = vor.u32 %v1308_v9, %v1168_v8 }
  0x23   :  { %335 = vmatpush.bf16.msra.mxu0 %v981_v48  ;;  %v1294_v3 = vld [vmem:[#allocation7 + $0xf4] sm:$0xf0]  ;;  %v1324_v11 = vld [vmem:[#allocation7 + $0x1e4] sm:$0xf0]  ;;  %v1049_v12 = vor.u32 %v1278_v1, %v1048_v0  ;;  %v1040_v14 = vld [vmem:[#allocation7 + $0x60] sm:$0xf] }
  0x24   :  { %348 = vmatpush.bf16.msra.mxu1 %v985_v52  ;;  %310 = vmatpush.bf16.msrb.mxu2 %v957_v47  ;;  %v1113_v13 = vor.u32 %v1294_v3, %v1112_v2  ;;  %v1276_v15 = vld [vmem:[#allocation7 + $0x64] sm:$0xf0]  ;;  %v1104_v16 = vld [vmem:[#allocation7 + $0xe0] sm:$0xf]  ;;  %v1233_v19 = vor.u32 %v1324_v11, %v1232_v10  ;;  %v1160_v20 = vld [vmem:[#allocation7 + $0x150] sm:$0xf] }
  0x25   :  { %323 = vmatpush.bf16.msrb.mxu3 %v961_v53  ;;  %v1292_v17 = vld [vmem:[#allocation7 + $0xe4] sm:$0xf0]  ;;  %v1306_v21 = vld [vmem:[#allocation7 + $0x154] sm:$0xf0]  ;;  %v1224_v22 = vld [vmem:[#allocation7 + $0x1d0] sm:$0xf]  ;;  %v1041_v24 = vor.u32 %v1276_v15, %v1040_v14 }
  0x26   :  { %v1322_v23 = vld [vmem:[#allocation7 + $0x1d4] sm:$0xf0]  ;;  %v1105_v25 = vor.u32 %v1292_v17, %v1104_v16  ;;  %v1032_v26 = vld [vmem:[#allocation7 + $0x50] sm:$0xf]  ;;  %v1161_v30 = vor.u32 %v1306_v21, %v1160_v20  ;;  %v1152_v32 = vld [vmem:[#allocation7 + $0x140] sm:$0xf] }
  0x27   :  { %336 = vmatpush.bf16.msra.mxu0 %v965_v57  ;;  %v1274_v27 = vld [vmem:[#allocation7 + $0x54] sm:$0xf0]  ;;  %v1096_v28 = vld [vmem:[#allocation7 + $0xd0] sm:$0xf]  ;;  %v1225_v31 = vor.u32 %v1322_v23, %v1224_v22  ;;  %v1304_v33 = vld [vmem:[#allocation7 + $0x144] sm:$0xf0] }
  0x28   :  { %349 = vmatpush.bf16.msra.mxu1 %v969_v59  ;;  %v1290_v29 = vld [vmem:[#allocation7 + $0xd4] sm:$0xf0]  ;;  %v1216_v34 = vld [vmem:[#allocation7 + $0x1c0] sm:$0xf]  ;;  %v1320_v35 = vld [vmem:[#allocation7 + $0x1c4] sm:$0xf0]  ;;  %v1033_v36 = vor.u32 %v1274_v27, %v1032_v26  ;;  %v1153_v43 = vor.u32 %v1304_v33, %v1152_v32 }
  0x29   :  { %v1097_v37 = vor.u32 %v1290_v29, %v1096_v28  ;;  %v1024_v38 = vld [vmem:[#allocation7 + $0x40] sm:$0xf]  ;;  %v1272_v39 = vld [vmem:[#allocation7 + $0x44] sm:$0xf0]  ;;  %v1217_v44 = vor.u32 %v1320_v35, %v1216_v34  ;;  %v1144_v45 = vld [vmem:[#allocation7 + $0x130] sm:$0xf] }
  0x2a   :  { %v1088_v40 = vld [vmem:[#allocation7 + $0xc0] sm:$0xf]  ;;  %v1288_v41 = vld [vmem:[#allocation7 + $0xc4] sm:$0xf0]  ;;  %v1302_v46 = vld [vmem:[#allocation7 + $0x134] sm:$0xf0]  ;;  %v1025_v49 = vor.u32 %v1272_v39, %v1024_v38 }
  0x2b   :  { %v1208_v47 = vld [vmem:[#allocation7 + $0x1b0] sm:$0xf]  ;;  %v1318_v48 = vld [vmem:[#allocation7 + $0x1b4] sm:$0xf0]  ;;  %v1089_v50 = vor.u32 %v1288_v41, %v1088_v40  ;;  %v1145_v52 = vor.u32 %v1302_v46, %v1144_v45  ;;  %v1136_v54 = vld [vmem:[#allocation7 + $0x120] sm:$0xf] }
  0x2c   :  { %v1209_v53 = vor.u32 %v1318_v48, %v1208_v47  ;;  %v1300_v55 = vld [vmem:[#allocation7 + $0x124] sm:$0xf0]  ;;  %v1200_v56 = vld [vmem:[#allocation7 + $0x1a0] sm:$0xf]  ;;  %v1016_v60 = vld [vmem:[#allocation7 + $0x30] sm:$0xf] }
  0x2d   :  { %v1316_v57 = vld [vmem:[#allocation7 + $0x1a4] sm:$0xf0]  ;;  %v1137_v58 = vor.u32 %v1300_v55, %v1136_v54  ;;  %v1270_v61 = vld [vmem:[#allocation7 + $0x34] sm:$0xf0]  ;;  %v1080_v62 = vld [vmem:[#allocation7 + $0xb0] sm:$0xf] }
  0x2e   :  { %v1201_v59 = vor.u32 %v1316_v57, %v1200_v56  ;;  %v1017_v63 = vor.u32 %v1270_v61, %v1016_v60  ;;  %v1286_v0 = vld [vmem:[#allocation7 + $0xb4] sm:$0xf0]  ;;  %v1128_v2 = vld [vmem:[#allocation7 + $0x110] sm:$0xf]  ;;  %v1268_v8 = vld [vmem:[#allocation7 + $0x24] sm:$0xf0] }
  0x2f   :  { %v1081_v1 = vor.u32 %v1286_v0, %v1080_v62  ;;  %v1298_v3 = vld [vmem:[#allocation7 + $0x114] sm:$0xf0]  ;;  %v1072_v11 = vld [vmem:[#allocation7 + $0xa0] sm:$0xf]  ;;  %v1296_v15 = vld [vmem:[#allocation7 + $0x104] sm:$0xf0] }
  0x30   :  { %v1120_v14 = vld [vmem:[#allocation7 + $0x100] sm:$0xf]  ;;  %v1178_v20 = vld [vmem:[#allocation7 + $0x178] sm:$0xf0]  ;;  %v1325_v23 = vld [vmem:[#allocation7 + $0x1f4] sm:$0xf] }
  0x31   :  { %v1184_v16 = vld [vmem:[#allocation7 + $0x180] sm:$0xf]  ;;  %v1121_v17 = vor.u32 %v1296_v15, %v1120_v14  ;;  %v1266_v27 = vld [vmem:[#allocation7 + $0x14] sm:$0xf0]  ;;  %v1064_v28 = vld [vmem:[#allocation7 + $0x90] sm:$0xf] }
  0x32   :  { %v1282_v29 = vld [vmem:[#allocation7 + $0x94] sm:$0xf0]  ;;  %v1307_v32 = vld [vmem:[#allocation7 + $0x164] sm:$0xf]  ;;  %v1170_v33 = vld [vmem:[#allocation7 + $0x168] sm:$0xf0] }
  0x33   :  { %v1323_v34 = vld [vmem:[#allocation7 + $0x1e4] sm:$0xf]  ;;  %v1173_v35 = vor.u32 %v1307_v32, %v1170_v33  ;;  %v1264_v38 = vld [vmem:[#allocation7 + $0x4] sm:$0xf0]  ;;  %v1056_v41 = vld [vmem:[#allocation7 + $0x80] sm:$0xf] }
  0x34   :  { %v1050_v45 = vld [vmem:[#allocation7 + $0x78] sm:$0xf0]  ;;  %v1293_v46 = vld [vmem:[#allocation7 + $0xf4] sm:$0xf]  ;;  %v1275_v56 = vld [vmem:[#allocation7 + $0x64] sm:$0xf] }
  0x35   :  { %v1114_v48 = vld [vmem:[#allocation7 + $0xf8] sm:$0xf0]  ;;  %v1042_v57 = vld [vmem:[#allocation7 + $0x68] sm:$0xf0]  ;;  %v1303_v62 = vld [vmem:[#allocation7 + $0x144] sm:$0xf] }
  0x36   :  { %v1226_v54 = vld [vmem:[#allocation7 + $0x1d8] sm:$0xf0]  ;;  %v1106_v60 = vld [vmem:[#allocation7 + $0xe8] sm:$0xf0] }
  0x37   :  { %v1210_v14 = vld [vmem:[#allocation7 + $0x1b8] sm:$0xf0] }
  0x38   :  { %v1082_v32 = vld [vmem:[#allocation7 + $0xb8] sm:$0xf0] }
  0x97   :  { %v114_v42 = vpop.f32.mrf.mxu0 }
  0x98   :  { %v144_v4 = vpop.f32.mrf.mxu1  ;;  %v147_v51 = vpack.c.bf16 %v114_v42, %v114_v42  ;;  %v1280_v42 = vld [vmem:[#allocation7 + $0x84] sm:$0xf0] }
  0x99   :  { %v156_v5 = vpack.c.bf16 %v144_v4, %v144_v4  ;;  %v1192_v4 = vld [vmem:[#allocation7 + $0x190] sm:$0xf] }
  0x9b   :  { %950 = vmatmul.msk.bf16.vlgmr.msra.gmra.mxu2 %vm93_vm1, %v156_v5  ;;  %951 = vmatmul.msk.bf16.vlgmr.msra.gmra.mxu3 %vm93_vm1, %v156_v5 }
  0x9c   :  { %952 = vmatmul.msk.bf16.vlgmr.msrb.gmra.mxu0 %vm93_vm1, %v156_v5  ;;  %953 = vmatmul.msk.bf16.vlgmr.msrb.gmra.mxu1 %vm93_vm1, %v156_v5  ;;  %v1129_v5 = vor.u32 %v1298_v3, %v1128_v2  ;;  %v1218_v2 = vld [vmem:[#allocation7 + $0x1c8] sm:$0xf0] }
  0x9d   :  { %789 = vmatpush.bf16.msrb.mxu0 %v1177_v6  ;;  %802 = vmatpush.bf16.msrb.mxu1 %v1241_v7  ;;  %v1314_v6 = vld [vmem:[#allocation7 + $0x194] sm:$0xf0]  ;;  %v1008_v7 = vld [vmem:[#allocation7 + $0x20] sm:$0xf] }
  0x9e   :  { %763 = vmatpush.bf16.msra.mxu2 %v1049_v12  ;;  %776 = vmatpush.bf16.msra.mxu3 %v1113_v13  ;;  %v1193_v9 = vor.u32 %v1314_v6, %v1192_v4  ;;  %v1009_v10 = vor.u32 %v1268_v8, %v1008_v7  ;;  %v1284_v12 = vld [vmem:[#allocation7 + $0xa4] sm:$0xf0]  ;;  %v1273_v4 = vld [vmem:[#allocation7 + $0x54] sm:$0xf]  ;;  %v1098_v8 = vld [vmem:[#allocation7 + $0xd8] sm:$0xf0] }
  0x9f   :  { %v1073_v13 = vor.u32 %v1284_v12, %v1072_v11  ;;  %v1289_v6 = vld [vmem:[#allocation7 + $0xd4] sm:$0xf]  ;;  %v1146_v11 = vld [vmem:[#allocation7 + $0x138] sm:$0xf0] }
  0xa0   :  { %v1317_v12 = vld [vmem:[#allocation7 + $0x1b4] sm:$0xf] }
  0xa1   :  { %790 = vmatpush.bf16.msrb.mxu0 %v1169_v18  ;;  %803 = vmatpush.bf16.msrb.mxu1 %v1233_v19  ;;  %v1312_v18 = vld [vmem:[#allocation7 + $0x184] sm:$0xf0]  ;;  %v1309_v19 = vld [vmem:[#allocation7 + $0x174] sm:$0xf]  ;;  %v1213_v15 = vor.u32 %v1317_v12, %v1210_v14 }
  0xa2   :  { %764 = vmatpush.bf16.msra.mxu2 %v1041_v24  ;;  %777 = vmatpush.bf16.msra.mxu3 %v1105_v25  ;;  %v1185_v21 = vor.u32 %v1312_v18, %v1184_v16  ;;  %v1181_v22 = vor.u32 %v1309_v19, %v1178_v20  ;;  %v1242_v24 = vld [vmem:[#allocation7 + $0x1f8] sm:$0xf0]  ;;  %v1000_v25 = vld [vmem:[#allocation7 + $0x10] sm:$0xf]  ;;  %v1271_v16 = vld [vmem:[#allocation7 + $0x44] sm:$0xf] }
  0xa3   :  { %v1245_v26 = vor.u32 %v1325_v23, %v1242_v24  ;;  %v1287_v19 = vld [vmem:[#allocation7 + $0xc4] sm:$0xf]  ;;  %v1090_v20 = vld [vmem:[#allocation7 + $0xc8] sm:$0xf0] }
  0xa4   :  { %v1138_v23 = vld [vmem:[#allocation7 + $0x128] sm:$0xf0]  ;;  %v1315_v24 = vld [vmem:[#allocation7 + $0x1a4] sm:$0xf] }
  0xa5   :  { %791 = vmatpush.bf16.msrb.mxu0 %v1161_v30  ;;  %804 = vmatpush.bf16.msrb.mxu1 %v1225_v31  ;;  %v1001_v30 = vor.u32 %v1266_v27, %v1000_v25  ;;  %v1065_v31 = vor.u32 %v1282_v29, %v1064_v28  ;;  %v1269_v28 = vld [vmem:[#allocation7 + $0x34] sm:$0xf]  ;;  %v1018_v29 = vld [vmem:[#allocation7 + $0x38] sm:$0xf0] }
  0xa6   :  { %765 = vmatpush.bf16.msra.mxu2 %v1033_v36  ;;  %778 = vmatpush.bf16.msra.mxu3 %v1097_v37  ;;  %v1234_v36 = vld [vmem:[#allocation7 + $0x1e8] sm:$0xf0]  ;;  %v992_v37 = vld [vmem:[#allocation7] sm:$0xf] }
  0xa7   :  { %v1237_v39 = vor.u32 %v1323_v34, %v1234_v36  ;;  %v993_v40 = vor.u32 %v1264_v38, %v992_v37  ;;  %v1297_v34 = vld [vmem:[#allocation7 + $0x114] sm:$0xf]  ;;  %v1194_v38 = vld [vmem:[#allocation7 + $0x198] sm:$0xf0] }
  0xa8   :  { %v1313_v36 = vld [vmem:[#allocation7 + $0x194] sm:$0xf] }
  0xa9   :  { %792 = vmatpush.bf16.msrb.mxu0 %v1153_v43  ;;  %805 = vmatpush.bf16.msrb.mxu1 %v1217_v44  ;;  %v1057_v43 = vor.u32 %v1280_v42, %v1056_v41  ;;  %v1277_v44 = vld [vmem:[#allocation7 + $0x74] sm:$0xf]  ;;  %v1197_v41 = vor.u32 %v1313_v36, %v1194_v38 }
  0xaa   :  { %766 = vmatpush.bf16.msra.mxu2 %v1025_v49  ;;  %779 = vmatpush.bf16.msra.mxu3 %v1089_v50  ;;  %v1053_v47 = vor.u32 %v1277_v44, %v1050_v45  ;;  %v1117_v49 = vor.u32 %v1293_v46, %v1114_v48  ;;  %v1305_v50 = vld [vmem:[#allocation7 + $0x154] sm:$0xf]  ;;  %v1074_v44 = vld [vmem:[#allocation7 + $0xa8] sm:$0xf0]  ;;  %v1295_v45 = vld [vmem:[#allocation7 + $0x104] sm:$0xf] }
  0xab   :  { %986 = vmatmul.msk.bf16.vlgmr.msrb.gmra.mxu2 %vm93_vm1, %v147_v51  ;;  %987 = vmatmul.msk.bf16.vlgmr.msrb.gmra.mxu3 %vm93_vm1, %v147_v51 }
  0xac   :  { %988 = vmatmul.msk.bf16.vlgmr.msra.gmra.mxu0 %vm93_vm1, %v147_v51  ;;  %989 = vmatmul.msk.bf16.vlgmr.msra.gmra.mxu1 %vm93_vm1, %v147_v51  ;;  %v1162_v51 = vld [vmem:[#allocation7 + $0x158] sm:$0xf0] }
  0xad   :  { %793 = vmatpush.bf16.msrb.mxu0 %v1145_v52  ;;  %806 = vmatpush.bf16.msrb.mxu1 %v1209_v53  ;;  %v1321_v52 = vld [vmem:[#allocation7 + $0x1d4] sm:$0xf]  ;;  %v1165_v53 = vor.u32 %v1305_v50, %v1162_v51  ;;  %v1311_v50 = vld [vmem:[#allocation7 + $0x184] sm:$0xf]  ;;  %v1186_v51 = vld [vmem:[#allocation7 + $0x188] sm:$0xf0] }
  0xae   :  { %767 = vmatpush.bf16.msra.mxu2 %v1017_v63  ;;  %780 = vmatpush.bf16.msra.mxu3 %v1081_v1  ;;  %v1229_v55 = vor.u32 %v1321_v52, %v1226_v54  ;;  %v1154_v63 = vld [vmem:[#allocation7 + $0x148] sm:$0xf0]  ;;  %v1319_v1 = vld [vmem:[#allocation7 + $0x1c4] sm:$0xf]  ;;  %v1265_v54 = vld [vmem:[#allocation7 + $0x14] sm:$0xf] }
  0xaf   :  { %v1157_v0 = vor.u32 %v1303_v62, %v1154_v63  ;;  %v1221_v3 = vor.u32 %v1319_v1, %v1218_v2  ;;  %v1263_v62 = vld [vmem:[#allocation7 + $0x4] sm:$0xf]  ;;  %v994_v63 = vld [vmem:[#allocation7 + $0x8] sm:$0xf0] }
  0xb1   :  { %794 = vmatpush.bf16.msrb.mxu0 %v1137_v58  ;;  %807 = vmatpush.bf16.msrb.mxu1 %v1201_v59  ;;  %v1291_v58 = vld [vmem:[#allocation7 + $0xe4] sm:$0xf]  ;;  %v1045_v59 = vor.u32 %v1275_v56, %v1042_v57  ;;  %v1281_v56 = vld [vmem:[#allocation7 + $0x94] sm:$0xf]  ;;  %v1066_v57 = vld [vmem:[#allocation7 + $0x98] sm:$0xf0] }
  0xb2   :  { %768 = vmatpush.bf16.msra.mxu2 %v1009_v10  ;;  %781 = vmatpush.bf16.msra.mxu3 %v1073_v13  ;;  %v1109_v61 = vor.u32 %v1291_v58, %v1106_v60  ;;  %v1301_v10 = vld [vmem:[#allocation7 + $0x134] sm:$0xf] }
  0xb3   :  { %v1149_v13 = vor.u32 %v1301_v10, %v1146_v11 }
  0xb5   :  { %795 = vmatpush.bf16.msrb.mxu0 %v1129_v5  ;;  %808 = vmatpush.bf16.msrb.mxu1 %v1193_v9  ;;  %v1034_v5 = vld [vmem:[#allocation7 + $0x58] sm:$0xf0]  ;;  %v1101_v9 = vor.u32 %v1289_v6, %v1098_v8 }
  0xb6   :  { %769 = vmatpush.bf16.msra.mxu2 %v1001_v30  ;;  %782 = vmatpush.bf16.msra.mxu3 %v1065_v31  ;;  %v1037_v7 = vor.u32 %v1273_v4, %v1034_v5  ;;  %v1285_v30 = vld [vmem:[#allocation7 + $0xb4] sm:$0xf]  ;;  %v1021_v31 = vor.u32 %v1269_v28, %v1018_v29  ;;  %v1058_v4 = vld [vmem:[#allocation7 + $0x88] sm:$0xf0]  ;;  %v355_v6 = vld [vmem:[%s1590_s6] sm:$0xf] }
  0xb7   :  { %v1085_v33 = vor.u32 %v1285_v30, %v1082_v32  ;;  %v360_v10 = vperm.slane %v355_v6, 3 }
  0xb9   :  { %796 = vmatpush.bf16.msrb.mxu0 %v1121_v17  ;;  %809 = vmatpush.bf16.msrb.mxu1 %v1185_v21  ;;  %v1026_v17 = vld [vmem:[#allocation7 + $0x48] sm:$0xf0]  ;;  %v1093_v21 = vor.u32 %v1287_v19, %v1090_v20 }
  0xba   :  { %770 = vmatpush.bf16.msra.mxu2 %v993_v40  ;;  %783 = vmatpush.bf16.msra.mxu3 %v1057_v43  ;;  %v1029_v18 = vor.u32 %v1271_v16, %v1026_v17  ;;  %v1010_v40 = vld [vmem:[#allocation7 + $0x28] sm:$0xf0]  ;;  %v1283_v43 = vld [vmem:[#allocation7 + $0xa4] sm:$0xf]  ;;  %v357_v17 = vperm.slane %v355_v6, 0 }
  0xbb   :  { %v1077_v48 = vor.u32 %v1283_v43, %v1074_v44 }
  0xbd   :  { %841 = vmatpush.bf16.msra.mxu0 %v1181_v22  ;;  %854 = vmatpush.bf16.msra.mxu1 %v1245_v26  ;;  %v1299_v22 = vld [vmem:[#allocation7 + $0x124] sm:$0xf]  ;;  %v1202_v26 = vld [vmem:[#allocation7 + $0x1a8] sm:$0xf0] }
  0xbe   :  { %815 = vmatpush.bf16.msrb.mxu2 %v1053_v47  ;;  %828 = vmatpush.bf16.msrb.mxu3 %v1117_v49  ;;  %v1141_v25 = vor.u32 %v1299_v22, %v1138_v23  ;;  %v1205_v27 = vor.u32 %v1315_v24, %v1202_v26  ;;  %v1122_v49 = vld [vmem:[#allocation7 + $0x108] sm:$0xf0] }
  0xbf   :  { %v1125_v52 = vor.u32 %v1295_v45, %v1122_v49 }
  0xc1   :  { %842 = vmatpush.bf16.msra.mxu0 %v1173_v35  ;;  %855 = vmatpush.bf16.msra.mxu1 %v1237_v39  ;;  %v1130_v35 = vld [vmem:[#allocation7 + $0x118] sm:$0xf0]  ;;  %v1267_v39 = vld [vmem:[#allocation7 + $0x24] sm:$0xf] }
  0xc2   :  { %816 = vmatpush.bf16.msrb.mxu2 %v1045_v59  ;;  %829 = vmatpush.bf16.msrb.mxu3 %v1109_v61  ;;  %v1133_v37 = vor.u32 %v1297_v34, %v1130_v35  ;;  %v1013_v42 = vor.u32 %v1267_v39, %v1010_v40  ;;  %v1069_v59 = vor.u32 %v1281_v56, %v1066_v57 }
  0xc5   :  { %843 = vmatpush.bf16.msra.mxu0 %v1165_v53  ;;  %856 = vmatpush.bf16.msra.mxu1 %v1229_v55  ;;  %v1189_v53 = vor.u32 %v1311_v50, %v1186_v51  ;;  %v1002_v55 = vld [vmem:[#allocation7 + $0x18] sm:$0xf0] }
  0xc6   :  { %817 = vmatpush.bf16.msrb.mxu2 %v1037_v7  ;;  %830 = vmatpush.bf16.msrb.mxu3 %v1101_v9  ;;  %v1005_v58 = vor.u32 %v1265_v54, %v1002_v55  ;;  %v359_v9 = vperm.slane %v355_v6, 2 }
  0xc9   :  { %844 = vmatpush.bf16.msra.mxu0 %v1157_v0  ;;  %857 = vmatpush.bf16.msra.mxu1 %v1221_v3  ;;  %v1279_v0 = vld [vmem:[#allocation7 + $0x84] sm:$0xf]  ;;  %v997_v3 = vor.u32 %v1263_v62, %v994_v63 }
  0xca   :  { %818 = vmatpush.bf16.msrb.mxu2 %v1029_v18  ;;  %831 = vmatpush.bf16.msrb.mxu3 %v1093_v21  ;;  %v1061_v5 = vor.u32 %v1279_v0, %v1058_v4  ;;  %v358_v18 = vperm.slane %v355_v6, 1 }
  0xcd   :  { %845 = vmatpush.bf16.msra.mxu0 %v1149_v13  ;;  %858 = vmatpush.bf16.msra.mxu1 %v1213_v15 }
  0xce   :  { %819 = vmatpush.bf16.msrb.mxu2 %v1021_v31  ;;  %832 = vmatpush.bf16.msrb.mxu3 %v1085_v33 }
  0xd1   :  { %846 = vmatpush.bf16.msra.mxu0 %v1141_v25  ;;  %859 = vmatpush.bf16.msra.mxu1 %v1205_v27 }
  0xd2   :  { %820 = vmatpush.bf16.msrb.mxu2 %v1013_v42  ;;  %833 = vmatpush.bf16.msrb.mxu3 %v1077_v48 }
  0xd5   :  { %847 = vmatpush.bf16.msra.mxu0 %v1133_v37  ;;  %860 = vmatpush.bf16.msra.mxu1 %v1197_v41  ;;  %v437_v37 = vld [vmem:[%s1592_s8] sm:$0x3] }
  0xd6   :  { %821 = vmatpush.bf16.msrb.mxu2 %v1005_v58  ;;  %834 = vmatpush.bf16.msrb.mxu3 %v1069_v59  ;;  %v439_v40 = vperm.slane %v437_v37, 0  ;;  %v440_v51 = vperm.slane %v437_v37, 1 }
  0xd9   :  { %848 = vmatpush.bf16.msra.mxu0 %v1125_v52  ;;  %861 = vmatpush.bf16.msra.mxu1 %v1189_v53 }
  0xda   :  { %822 = vmatpush.bf16.msrb.mxu2 %v997_v3  ;;  %835 = vmatpush.bf16.msrb.mxu3 %v1061_v5 }
 0x119   :  { %v243_v46 = vpop.f32.mrf.mxu0  ;;  %v256_v47 = vpop.f32.mrf.mxu1 }
 0x11e   :  { %v217_v60 = vpop.f32.mrf.mxu2  ;;  %v230_v61 = vpop.f32.mrf.mxu3 }
 0x121   :  { %v245_v1 = vpop.f32.mrf.mxu0  ;;  %v258_v2 = vpop.f32.mrf.mxu1 }
 0x126   :  { %v219_v7 = vpop.f32.mrf.mxu2  ;;  %v232_v8 = vpop.f32.mrf.mxu3 }
 0x127   :  { %v1334_v7 = vld [vmem:[#allocation2] ss:$0 sm:$0xff] }
 0x129   :  { %v338_v11 = vpop.f32.mrf.mxu0  ;;  %v351_v12 = vpop.f32.mrf.mxu1 }
 0x12a   :  { %v339_v13 = vadd.f32 %v338_v11, %v243_v46  ;;  %v352_v14 = vadd.f32 %v351_v12, %v256_v47  ;;  %v867_v46 = vld [vmem:[%s1593_s9] sm:$0x3] }
 0x12b   :  { %v868_v48 = vunpack.c.l.bf16 %v867_v46 }
 0x12c   :  { %v367_v15 = vadd.f32 %v359_v9, %v339_v13  ;;  %v368_v16 = vadd.f32 %v360_v10, %v352_v14 }
 0x12d   :  { %v870_v53 = vperm.slane %v868_v48, 0  ;;  %v871_v57 = vperm.slane %v868_v48, 2 }
 0x12e   :  { %v371_v19 = vpack.c.bf16 %v367_v15, %v367_v15  ;;  %v372_v20 = vpack.c.bf16 %v368_v16, %v368_v16  ;;  %v312_v21 = vpop.f32.mrf.mxu2  ;;  %v325_v22 = vpop.f32.mrf.mxu3 }
 0x12f   :  { %v313_v23 = vadd.f32 %v312_v21, %v217_v60  ;;  %v326_v24 = vadd.f32 %v325_v22, %v230_v61  ;;  %v874_v60 = vperm.slane %v870_v53, 0  ;;  %v875_v62 = vperm.slane %v871_v57, 0 }
 0x130   :  { %797 = vmatmul.bf16.vlgmr.msrb.gmra.mxu0 %v371_v19  ;;  %810 = vmatmul.bf16.vlgmr.msrb.gmra.mxu1 %v372_v20 }
 0x131   :  { %v365_v25 = vadd.f32 %v357_v17, %v313_v23  ;;  %v366_v26 = vadd.f32 %v358_v18, %v326_v24  ;;  %v340_v27 = vpop.f32.mrf.mxu0  ;;  %v353_v28 = vpop.f32.mrf.mxu1 }
 0x133   :  { %v369_v29 = vpack.c.bf16 %v365_v25, %v365_v25  ;;  %v370_v30 = vpack.c.bf16 %v366_v26, %v366_v26 }
 0x135   :  { %771 = vmatmul.bf16.vlgmr.msra.gmra.mxu2 %v369_v29  ;;  %784 = vmatmul.bf16.vlgmr.msra.gmra.mxu3 %v370_v30 }
 0x136   :  { %v314_v31 = vpop.f32.mrf.mxu2  ;;  %v327_v32 = vpop.f32.mrf.mxu3 }
 0x140   :  { %849 = vmatmul.bf16.vlgmr.msra.gmra.mxu0 %v371_v19  ;;  %862 = vmatmul.bf16.vlgmr.msra.gmra.mxu1 %v372_v20 }
 0x145   :  { %823 = vmatmul.bf16.vlgmr.msrb.gmra.mxu2 %v369_v29  ;;  %836 = vmatmul.bf16.vlgmr.msrb.gmra.mxu3 %v370_v30 }
 0x1ad   :  { %v798_v33 = vpop.f32.mrf.mxu0  ;;  %v811_v34 = vpop.f32.mrf.mxu1 }
 0x1b5   :  { %v800_v35 = vpop.f32.mrf.mxu0  ;;  %v813_v36 = vpop.f32.mrf.mxu1 }
 0x1b8   :  { %v772_v38 = vpop.f32.mrf.mxu2  ;;  %v785_v39 = vpop.f32.mrf.mxu3 }
 0x1b9   :  { %v773_v43 = vadd.f32 %v772_v38, %v439_v40 }
 0x1bb   :  { %v786_v47 = vadd.f32 %v785_v39, %v773_v43 }
 0x1bd   :  { %v850_v41 = vpop.f32.mrf.mxu0  ;;  %v863_v42 = vpop.f32.mrf.mxu1  ;;  %v799_v52 = vadd.f32 %v798_v33, %v786_v47 }
 0x1bf   :  { %v812_v58 = vadd.f32 %v811_v34, %v799_v52 }
 0x1c0   :  { %v774_v44 = vpop.f32.mrf.mxu2  ;;  %v787_v45 = vpop.f32.mrf.mxu3 }
 0x1c1   :  { %v876_v0 = vmul.f32 %v874_v60, %v812_v58 }
 0x1c3   :  { %v879_v4 = vsel %vm878_vm2, %v876_v0, 0.0 }
 0x1c5   :  { %v852_v49 = vpop.f32.mrf.mxu0  ;;  %v865_v50 = vpop.f32.mrf.mxu1 }
 0x1c8   :  { %v824_v54 = vpop.f32.mrf.mxu2  ;;  %v837_v55 = vpop.f32.mrf.mxu3 }
 0x1c9   :  { %v825_v56 = vadd.f32 %v824_v54, %v440_v51 }
 0x1cb   :  { %v838_v59 = vadd.f32 %v837_v55, %v825_v56 }
 0x1cd   :  { %v851_v61 = vadd.f32 %v850_v41, %v838_v59 }
 0x1cf   :  { %v864_v63 = vadd.f32 %v863_v42, %v851_v61 }
 0x1d0   :  { %v826_v1 = vpop.f32.mrf.mxu2  ;;  %v839_v2 = vpop.f32.mrf.mxu3 }
 0x1d1   :  { %v877_v3 = vmul.f32 %v875_v62, %v864_v63 }
 0x1d3   :  { %v880_v5 = vsel %vm878_vm2, %v877_v3, 0.0 }
 0x1d4   :  { %v881_v6 = vadd.f32 %v880_v5, %v879_v4 }
 0x1d6   :  { %882 = vadd.xlane.f32.xlu0 %v881_v6 }
 0x249   :  { %v883_v8 = vpop.xlane.xlu0 %882 }
 0x24a   :  { %v888_v9 = vadd.f32 %v1334_v7, %v883_v8 }
 0x24c   :  { %v1246_v10 = vmul.f32 -1.442695, %v888_v9 }
 0x24e   :  { %1335 = vpow2.f32 %v1246_v10 }
 0x254   :  { %v1336_v11 = vpop.eup %1335 }
 0x255   :  { %v892_v12 = vadd.f32 1.0, %v1336_v11 }
 0x257   :  { %1337 = vrcp.f32 %v892_v12  ;;  %v904_v16 = vand.u32 2147483648, %v892_v12  ;;  %v902_v18 = vand.u32 2147483647, %v892_v12  ;;  %vm898_vm4 = vweird.f32 %v892_v12 }
 0x259   :  { %v905_v20 = vor.u32 1.1754944e-38, %v904_v16  ;;  %vm903_vm7 = vcmp.eq.f32.partialorder %v902_v18, 8.507059e+37 }
 0x25d   :  { %v1338_v13 = vpop.eup %1337 }
 0x25e   :  { %v894_v14 = vmul.f32 %v1338_v13, %v892_v12  ;;  %vm899_vm3 = vweird.f32 %v1338_v13 }
 0x25f   :  { %vm900_vm5 = vmor %vm898_vm4, %vm899_vm3 }
 0x260   :  { %v895_v15 = vsub.f32 1.0, %v894_v14 }
 0x262   :  { %v896_v17 = vmul.f32 %v1338_v13, %v895_v15 }
 0x264   :  { %v897_v19 = vadd.f32 %v1338_v13, %v896_v17 }
 0x266   :  { %v901_v21 = vsel %vm900_vm5, %v1338_v13, %v897_v19 }
 0x267   :  { %v906_v22 = vsel %vm903_vm7, %v905_v20, %v901_v21 }
 0x268   :  { %909 = vst.msk [vmem:[%s1595_s11] sm:$0x3] %vm908_vm6, %v906_v22 }
 0x269   :  { %914 = vsyncpa [#allocation4], 1 }
 0x26a   :  { %915 = vsyncpa [#allocation6], 1 }

</bundles_post_ra>
